<compile_context>
chip_gen: v5e
topology: v5e:2x2
jax: 0.10.0
libtpu: 0.0.40
codegen_flags: <defaults>
</compile_context>

<pallas_src>
import functools

import jax
import jax.numpy as jnp
from jax.experimental import pallas as pl
from jax.experimental.pallas import tpu as pltpu

_MIB = 1024 * 1024


def _round_up(x: int, m: int) -> int:
    return ((x + m - 1) // m) * m


def autorec_kernel(x_ref, w1_ref, b1_ref, w2_ref, b2_ref, o_ref, h_ref, *,
                   tile_f: int, w2_resident: bool):
    # x_ref : (TB, F_pad)        batch tile of the (padded) input, bf16
    # w1_ref: (F_pad, H_pad)     fci weight (pre-transposed), bf16, grid-invariant
    # b1_ref: (1, H_pad)         fci bias, f32, grid-invariant
    # w2_ref: (H_pad, F_pad|TF)  fco weight: fully resident, or a feature-tile slice
    # b2_ref: (1, F_pad|TF)      fco bias (matching layout)
    # o_ref : (TB, TF)           output tile
    # h_ref : (TB, H_pad)        VMEM scratch holding relu(fci(x)) for this batch tile
    j = pl.program_id(1)

    # Compute the hidden activation once per batch tile (j == 0) and reuse it
    # for every output-feature tile.  CORRECTNESS NOTE: this relies on grid
    # axis 1 being the innermost, sequentially executed ("arbitrary") axis per
    # core.  Do NOT reorder the grid or mark axis 1 "parallel".
    @pl.when(j == 0)
    def _():
        h = jnp.dot(x_ref[...], w1_ref[...], preferred_element_type=jnp.float32)
        # Intentional numerics: the post-ReLU activation is downcast to bf16
        # for the second MXU matmul (accumulation stays f32).
        h_ref[...] = jnp.maximum(h + b1_ref[...], 0.0).astype(h_ref.dtype)

    if w2_resident:
        col = pl.multiple_of(j * tile_f, tile_f)        # lane-aligned: tile_f % 128 == 0
        w2 = w2_ref[:, pl.ds(col, tile_f)]
        b2 = b2_ref[:, pl.ds(col, tile_f)]
    else:
        w2 = w2_ref[...]
        b2 = b2_ref[...]

    y = jnp.dot(h_ref[...], w2, preferred_element_type=jnp.float32)
    o_ref[...] = (y + b2).astype(o_ref.dtype)


def _vmem_bytes(tb, tf, F_pad, H_pad, w2_resident, out_itemsize,
                x_bufs=3, out_bufs=2):
    """Rough resident-set estimate (bf16 operands, f32 biases)."""
    total = x_bufs * tb * F_pad * 2               # x batch tile (triple-buffered)
    total += F_pad * H_pad * 2                    # W1 (single-buffered, resident)
    total += H_pad * 4                            # b1
    if w2_resident:
        total += H_pad * F_pad * 2 + F_pad * 4    # W2 / b2 resident, single buffer
    else:
        total += 2 * (H_pad * tf * 2 + tf * 4)    # W2 / b2 slices, double buffer
    total += out_bufs * tb * tf * out_itemsize    # output tiles
    total += tb * H_pad * 2                       # h scratch
    return total


def _default_vmem_limit():
    try:
        cap = pltpu.get_tpu_info().vmem_capacity_bytes
    except Exception:
        cap = 64 * _MIB          # conservative default, valid on every TPU gen
    # ~100 MiB on 128-MiB chips (v5e/v6e), ~50 MiB on v7x (64 MiB per TC).
    return int(cap * 0.78)


def _build_and_run(x_p, w1_p, b1_p, w2_p, b2_p, *, tb, tf, F_pad, H_pad, B_pad,
                   w2_resident, out_dtype, compute_dtype, vmem_limit_bytes,
                   cost, use_buffer_hints):
    kernel = functools.partial(autorec_kernel, tile_f=tf, w2_resident=w2_resident)

    def spec(shape, index_map, bufs=None):
        if bufs is None or not use_buffer_hints:
            return pl.BlockSpec(shape, index_map)
        return pl.BlockSpec(shape, index_map, pipeline_mode=pl.Buffered(bufs))

    in_specs = [
        spec((tb, F_pad),    lambda i, j: (i, 0), bufs=3),   # x: deep prefetch
        spec((F_pad, H_pad), lambda i, j: (0, 0), bufs=1),   # W1: grid-invariant
        spec((1, H_pad),     lambda i, j: (0, 0), bufs=1),   # b1: grid-invariant
    ]
    if w2_resident:
        in_specs += [
            spec((H_pad, F_pad), lambda i, j: (0, 0), bufs=1),   # W2 resident
            spec((1, F_pad),     lambda i, j: (0, 0), bufs=1),   # b2 resident
        ]
    else:
        in_specs += [
            spec((H_pad, tf), lambda i, j: (0, j)),              # W2 feature slice
            spec((1, tf),     lambda i, j: (0, j)),              # b2 feature slice
        ]

    return pl.pallas_call(
        kernel,
        out_shape=jax.ShapeDtypeStruct((B_pad, F_pad), out_dtype),
        grid_spec=pltpu.PrefetchScalarGridSpec(
            num_scalar_prefetch=0,
            grid=(B_pad // tb, F_pad // tf),
            in_specs=in_specs,
            out_specs=pl.BlockSpec((tb, tf), lambda i, j: (i, j)),
            scratch_shapes=[pltpu.VMEM((tb, H_pad), compute_dtype)],
        ),
        compiler_params=pltpu.CompilerParams(
            # batch axis shards across TensorCores; feature axis MUST stay
            # sequential so the h scratch reuse is valid.
            dimension_semantics=("parallel", "arbitrary"),
            vmem_limit_bytes=int(vmem_limit_bytes),
        ),
        cost_estimate=cost,
    )(x_p, w1_p, b1_p, w2_p, b2_p)


def autorec_forward(x, w1_t, b1, w2_t, b2, *, tile_b=256, tile_f=512,
                    compute_dtype=jnp.bfloat16, out_dtype=None,
                    vmem_limit_bytes=None):
    """Fused Autorec forward: fco(relu(fci(x))).

    x     : (B, F_in)
    w1_t  : (F_in, H)   fci.weight pre-transposed
    b1    : (1, H)
    w2_t  : (H, F_in)   fco.weight pre-transposed
    b2    : (1, F_in)
    """
    B, F_in = x.shape
    F_in_w, H = w1_t.shape
    assert F_in_w == F_in and w2_t.shape == (H, F_in)
    assert b1.shape == (1, H) and b2.shape == (1, F_in)
    out_dtype = jnp.dtype(x.dtype if out_dtype is None else out_dtype)
    out_itemsize = out_dtype.itemsize

    if vmem_limit_bytes is None:
        vmem_limit_bytes = _default_vmem_limit()
    budget = int(vmem_limit_bytes * 0.9)      # headroom for compiler scratch

    # ---- TPU-friendly padding (lane = 128, sublane = 8) ---------------------
    H_pad = _round_up(H, 128)                                  # hidden dim (lane axis of h)
    tf = min(_round_up(tile_f, 128), _round_up(F_in, 128))     # lane-dense output tile
    F_pad = _round_up(F_in, tf)

    # Batch tile: multiple of 8; guarantee >= 2 batch tiles when the batch is
    # big enough (v7x megacore balance), then shrink to fit the VMEM budget.
    B8 = _round_up(B, 8)
    tb = min(_round_up(tile_b, 8), B8)
    if B8 // tb < 2 and B8 >= 16:
        tb = _round_up(B8 // 2, 8)
    w2_resident = _vmem_bytes(tb, tf, F_pad, H_pad, True, out_itemsize) <= budget
    while tb > 8 and _vmem_bytes(tb, tf, F_pad, H_pad, w2_resident, out_itemsize) > budget:
        tb = _round_up(tb // 2, 8)
    B_pad = _round_up(B, tb)

    x_p = jnp.pad(x, ((0, B_pad - B), (0, F_pad - F_in))).astype(compute_dtype)
    w1_p = jnp.pad(w1_t, ((0, F_pad - F_in), (0, H_pad - H))).astype(compute_dtype)
    b1_p = jnp.pad(b1, ((0, 0), (0, H_pad - H))).astype(jnp.float32)
    w2_p = jnp.pad(w2_t, ((0, H_pad - H), (0, F_pad - F_in))).astype(compute_dtype)
    b2_p = jnp.pad(b2, ((0, 0), (0, F_pad - F_in))).astype(jnp.float32)

    n_btiles = B_pad // tb
    w2_reads = 1 if w2_resident else n_btiles
    itemsize = lambda a: a.size * jnp.dtype(a.dtype).itemsize
    cost = pl.CostEstimate(
        flops=4 * B_pad * F_pad * H_pad,        # two matmuls, 2*B*F*H each
        transcendentals=0,
        bytes_accessed=(itemsize(x_p) + itemsize(w1_p) + itemsize(b1_p)
                        + w2_reads * (itemsize(w2_p) + itemsize(b2_p))
                        + B_pad * F_pad * out_itemsize),
    )

    kwargs = dict(tb=tb, tf=tf, F_pad=F_pad, H_pad=H_pad, B_pad=B_pad,
                  w2_resident=w2_resident, out_dtype=out_dtype,
                  compute_dtype=compute_dtype,
                  vmem_limit_bytes=vmem_limit_bytes, cost=cost)
    try:
        out = _build_and_run(x_p, w1_p, b1_p, w2_p, b2_p,
                             use_buffer_hints=True, **kwargs)
    except Exception:
        # Fallback: identical kernel without the pl.Buffered pipeline hints.
        out = _build_and_run(x_p, w1_p, b1_p, w2_p, b2_p,
                             use_buffer_hints=False, **kwargs)

    return out[:B, :F_in]


def init_autorec_params(key, input_features, hidden_dim, dtype=jnp.float32):
    """Deterministic init mimicking nn.Linear default (uniform +-1/sqrt(fan_in))."""
    k1, k2, k3, k4 = jax.random.split(key, 4)
    lim1 = 1.0 / jnp.sqrt(jnp.float32(input_features))
    lim2 = 1.0 / jnp.sqrt(jnp.float32(hidden_dim))
    # Stored pre-transposed: (in, out)
    w1_t = jax.random.uniform(k1, (input_features, hidden_dim), dtype, -lim1, lim1)
    b1   = jax.random.uniform(k2, (1, hidden_dim),              dtype, -lim1, lim1)
    w2_t = jax.random.uniform(k3, (hidden_dim, input_features), dtype, -lim2, lim2)
    b2   = jax.random.uniform(k4, (1, input_features),          dtype, -lim2, lim2)
    return w1_t, b1, w2_t, b2


if __name__ == "__main__":
    # Small, deliberately "ragged" shapes to exercise padding, the auto batch
    # tiling (40 rows -> two tiles of 24 for megacore balance), lane padding
    # (200 -> 256 features, 48 -> 128 hidden) and the resident-W2 path.
    B, F_IN, H = 40, 200, 48

    key = jax.random.PRNGKey(0)
    kx, kp = jax.random.split(key)
    x = jax.random.normal(kx, (B, F_IN), jnp.float32)
    w1_t, b1, w2_t, b2 = init_autorec_params(kp, F_IN, H)

    y = autorec_forward(x, w1_t, b1, w2_t, b2)
    y = jax.block_until_ready(y)

    # Pure-JAX reference with the same numerics (bf16 operands, f32 accumulate).
    xb = x.astype(jnp.bfloat16)
    h_ref = jnp.maximum(
        jnp.dot(xb, w1_t.astype(jnp.bfloat16),
                preferred_element_type=jnp.float32) + b1, 0.0)
    y_ref = jnp.dot(h_ref.astype(jnp.bfloat16), w2_t.astype(jnp.bfloat16),
                    preferred_element_type=jnp.float32) + b2

    assert y.shape == (B, F_IN)
    assert jnp.allclose(y, y_ref, atol=1e-2, rtol=1e-2), \
        float(jnp.max(jnp.abs(y - y_ref)))

    print("KERNEL_OK")
</pallas_src>

<mosaic_0001>
module attributes {stable_mosaic.version = 11 : i64} {
  func.func @autorec_kernel(%arg0: i32, %arg1: i32, %arg2: memref<24x256xbf16, #tpu.memory_space<vmem>>, %arg3: memref<256x128xbf16, #tpu.memory_space<vmem>>, %arg4: memref<1x128xf32, #tpu.memory_space<vmem>>, %arg5: memref<128x256xbf16, #tpu.memory_space<vmem>>, %arg6: memref<1x256xf32, #tpu.memory_space<vmem>>, %arg7: memref<24x256xf32, #tpu.memory_space<vmem>>, %arg8: memref<24x128xbf16, #tpu.memory_space<vmem>>) attributes {dimension_semantics = [#tpu.dimension_semantics<parallel>, #tpu.dimension_semantics<arbitrary>], iteration_bounds = array<i64: 2, 1>, scalar_prefetch = 0 : i64, scratch_operands = 1 : i64, tpu.core_type = #tpu.core_type<tc>, window_params = [{transform_indices = @transform_0, window_bounds = array<i64: 24, 256>}, {pipeline_mode = #tpu.pipeline_mode<synchronous>, transform_indices = @transform_1, window_bounds = array<i64: 256, 128>}, {pipeline_mode = #tpu.pipeline_mode<synchronous>, transform_indices = @transform_2, window_bounds = array<i64: 1, 128>}, {pipeline_mode = #tpu.pipeline_mode<synchronous>, transform_indices = @transform_3, window_bounds = array<i64: 128, 256>}, {pipeline_mode = #tpu.pipeline_mode<synchronous>, transform_indices = @transform_4, window_bounds = array<i64: 1, 256>}, {transform_indices = @transform_5, window_bounds = array<i64: 24, 256>}]} {
    %c0_i32 = arith.constant 0 : i32
    %0 = arith.cmpi eq, %arg1, %c0_i32 : i32
    %1 = arith.extui %0 : i1 to i32
    %c0_i32_0 = arith.constant 0 : i32
    %2 = arith.cmpi ne, %1, %c0_i32_0 : i32
    scf.if %2 {
      %c0_6 = arith.constant 0 : index
      %c0_7 = arith.constant 0 : index
      %14 = vector.load %arg2[%c0_6, %c0_7] : memref<24x256xbf16, #tpu.memory_space<vmem>>, vector<24x256xbf16>
      %c0_8 = arith.constant 0 : index
      %c0_9 = arith.constant 0 : index
      %15 = vector.load %arg3[%c0_8, %c0_9] : memref<256x128xbf16, #tpu.memory_space<vmem>>, vector<256x128xbf16>
      %cst_10 = arith.constant dense<0.000000e+00> : vector<24x128xf32>
      %16 = tpu.matmul %14, %15, %cst_10 {dimension_numbers = #tpu.dot_dimension_numbers<[1], [0], [0], [1], [0, 0, 1, 1], [], []>} : vector<24x256xbf16>, vector<256x128xbf16>, vector<24x128xf32> -> vector<24x128xf32>
      %c0_11 = arith.constant 0 : index
      %c0_12 = arith.constant 0 : index
      %17 = vector.load %arg4[%c0_11, %c0_12] : memref<1x128xf32, #tpu.memory_space<vmem>>, vector<1x128xf32>
      %18 = vector.broadcast %17 : vector<1x128xf32> to vector<24x128xf32>
      %19 = arith.addf %16, %18 : vector<24x128xf32>
      %cst_13 = arith.constant 0.000000e+00 : f32
      %20 = vector.broadcast %cst_13 : f32 to vector<24x128xf32>
      %21 = arith.maximumf %19, %20 : vector<24x128xf32>
      %22 = arith.truncf %21 : vector<24x128xf32> to vector<24x128xbf16>
      %c0_14 = arith.constant 0 : index
      %c0_15 = arith.constant 0 : index
      %23 = vector.load %arg8[%c0_14, %c0_15] : memref<24x128xbf16, #tpu.memory_space<vmem>>, vector<24x128xbf16>
      tpu.vector_store %arg8[%c0_14, %c0_15], %22 {strides = array<i32>} : memref<24x128xbf16, #tpu.memory_space<vmem>>, vector<24x128xbf16>,
    } else {
    }
    %c256_i32 = arith.constant 256 : i32
    %3 = arith.muli %arg1, %c256_i32 : i32
    %4 = tpu.assume_multiple %3, 256 : i32
    %c0 = arith.constant 0 : index
    %5 = arith.index_cast %4 : i32 to index
    %6 = vector.load %arg5[%c0, %5] : memref<128x256xbf16, #tpu.memory_space<vmem>>, vector<128x256xbf16>
    %c0_1 = arith.constant 0 : index
    %7 = arith.index_cast %4 : i32 to index
    %8 = vector.load %arg6[%c0_1, %7] : memref<1x256xf32, #tpu.memory_space<vmem>>, vector<1x256xf32>
    %c0_2 = arith.constant 0 : index
    %c0_3 = arith.constant 0 : index
    %9 = vector.load %arg8[%c0_2, %c0_3] : memref<24x128xbf16, #tpu.memory_space<vmem>>, vector<24x128xbf16>
    %cst = arith.constant dense<0.000000e+00> : vector<24x256xf32>
    %10 = tpu.matmul %9, %6, %cst {dimension_numbers = #tpu.dot_dimension_numbers<[1], [0], [0], [1], [0, 0, 1, 1], [], []>} : vector<24x128xbf16>, vector<128x256xbf16>, vector<24x256xf32> -> vector<24x256xf32>
    %11 = vector.broadcast %8 : vector<1x256xf32> to vector<24x256xf32>
    %12 = arith.addf %10, %11 : vector<24x256xf32>
    %c0_4 = arith.constant 0 : index
    %c0_5 = arith.constant 0 : index
    %13 = vector.load %arg7[%c0_4, %c0_5] : memref<24x256xf32, #tpu.memory_space<vmem>>, vector<24x256xf32>
    tpu.vector_store %arg7[%c0_4, %c0_5], %12 {strides = array<i32>} : memref<24x256xf32, #tpu.memory_space<vmem>>, vector<24x256xf32>,
    return
  }
  func.func @transform_0(%arg0: i32, %arg1: i32) -> (i32, i32) {
    %c0_i32 = arith.constant 0 : i32
    %c0_i32_0 = arith.constant 0 : i32
    return %arg0, %c0_i32 : i32, i32
  }
  func.func @transform_1(%arg0: i32, %arg1: i32) -> (i32, i32) {
    %c0_i32 = arith.constant 0 : i32
    %c0_i32_0 = arith.constant 0 : i32
    %c0_i32_1 = arith.constant 0 : i32
    return %c0_i32, %c0_i32_0 : i32, i32
  }
  func.func @transform_2(%arg0: i32, %arg1: i32) -> (i32, i32) {
    %c0_i32 = arith.constant 0 : i32
    %c0_i32_0 = arith.constant 0 : i32
    %c0_i32_1 = arith.constant 0 : i32
    return %c0_i32, %c0_i32_0 : i32, i32
  }
  func.func @transform_3(%arg0: i32, %arg1: i32) -> (i32, i32) {
    %c0_i32 = arith.constant 0 : i32
    %c0_i32_0 = arith.constant 0 : i32
    %c0_i32_1 = arith.constant 0 : i32
    return %c0_i32, %c0_i32_0 : i32, i32
  }
  func.func @transform_4(%arg0: i32, %arg1: i32) -> (i32, i32) {
    %c0_i32 = arith.constant 0 : i32
    %c0_i32_0 = arith.constant 0 : i32
    %c0_i32_1 = arith.constant 0 : i32
    return %c0_i32, %c0_i32_0 : i32, i32
  }
  func.func @transform_5(%arg0: i32, %arg1: i32) -> (i32, i32) {
    %c0_i32 = arith.constant 0 : i32
    return %arg0, %arg1 : i32, i32
  }
}

</mosaic_0001>

<bundles_post_ra>
// kernel: tpu_custom_call.1
= control target key start
LH: loop header
LB: loop body
LE: loop exit
PB: predicated region body
PF: predicated region fallthrough
CT: control target
= control target key end

     0   :  { %s1461_s0 = inlined_call_operand.hbm [shape: bf16[48,256], index: 0, kind: input, shape index: {}]   ;;  %s1462_s1 = inlined_call_operand.hbm [shape: bf16[256,128], index: 1, kind: input, shape index: {}]   ;;  %s1463_s2 = inlined_call_operand.vmem [shape: f32[1,128], index: 2, kind: input, shape index: {}]   ;;  %s1464_s3 = inlined_call_operand.hbm [shape: bf16[128,256], index: 3, kind: input, shape index: {}]   ;;  %s1465_s4 = inlined_call_operand.vmem [shape: f32[1,256], index: 4, kind: input, shape index: {}]   ;;  %s1466_s5 = inlined_call_operand.hbm [shape: f32[48,256], index: 5, kind: output, shape index: {}]  }
   0x1   :  { %1469 = sst [smem:[#allocation13_spill]] %s1462_s1 }
   0x2   :  { %1470 = sst [smem:[#allocation14_spill]] %s1464_s3 }
   0x3   :  { %10 = vsyncpa [#allocation4], 0 }
   0x4   :  { %12 = vsyncpa [#allocation4 + $0x1], 0 }
   0x5   :  { %13 = vsyncpa [#allocation7], 0 }
   0x6   :  { %14 = vsyncpa [#allocation5], 0 }
   0x7   :  { %16 = vsyncpa [#allocation5 + $0x1], 0  ;;  %s1295_s18 = smov 0   ;;  %s1297_s19 = smov 0  }
   0x8   :  { %s1299_s20 = smov 0   ;;  %s1301_s21 = smov 0  }
   0x9   :  { %s1303_s22 = smov 0   ;;  %s1305_s23 = smov 0  }
   0xa LB: > { %s785_s24 = sadd.s32 4294967295, %s1255_s23   ;;  %s786_s25 = sadd.s32 4294967294, %s1255_s23   ;;  %s1255_s23 = sphi %s1305_s23, %s22_s23   ;;  %s1251_s22 = sphi %s1303_s22, %s1485_s22   ;;  %s1247_s21 = sphi %s1301_s21, %s1484_s21   ;;  %s1243_s20 = sphi %s1299_s20, %s1483_s20   ;;  %s1239_s19 = sphi %s1297_s19, %s1482_s19   ;;  %s1235_s18 = sphi %s1295_s18, %s1481_s18  }
   0xb   : > { %p54_p0 = scmp.ne.s32.totalorder %s1239_s19, %s1235_s18  ;;  %p1329_p1 = scmp.eq.s32.totalorder %s785_s24, 0 }
   0xc   : > { %p1333_p2 = scmp.eq.s32.totalorder %s785_s24, 1  ;;  %p170_p3 = scmp.eq.s32.totalorder %s786_s25, 1 }
   0xd   : > { %p1339_p4 = por %p1329_p1, %p54_p0  ;;  %p787_p5 = scmp.ge.s32.totalorder %s1255_s23, 1 }
   0xe   : > { %p1344_p6 = por %p170_p3, %p54_p0  ;;  %p177_p7 = scmp.lt.s32.totalorder %s1255_s23, 3 }
   0xf   : > { %s1475_s1 = sld [smem:[#allocation13_spill]]  ;;  %s1257_s9 = smov [#allocation6]  }
  0x10   : > { %p1352_p8 = pnand %p787_p5, %p177_p7  ;;  %s190_s10 = sshll.u32 %s1257_s9, 4  ;;  %s191_s10 = int_to_ptr.vmem [resolvable:$true] %s190_s10 }
  0x11   : > { %p790_p11 = scmp.ge.s32.totalorder %s1255_s23, 2  ;;  %s1477_s3 = sld [smem:[#allocation14_spill]] }
  0x12   : > { %p1001_p9 = pneg %p1352_p8  ;;  %s1258_s14 = smov 64  }
  0x13   : > { %s1259_s15 = smov 4   ;;  %s1260_s16 = smov [#allocation8]  }
  0x14   : > { %p1002_p10 = pnand %p1001_p9, %p1329_p1  ;;  %s207_s17 = sshll.u32 %s1260_s16, 4  ;;  %s208_s17 = int_to_ptr.vmem [resolvable:$true] %s207_s17 }
  0x15   : > { %s188_s7 = sshll.u32 %s1475_s1, 4  ;;  %s1467_s24 = smov 128   ;;  %s189_s7 = int_to_ptr.hbm [resolvable:$true] %s188_s7 }
  0x16   : > { %1004 = dma.hbm_to_vmem [thread:$0]  (!%p1002_p10), %s189_s7, 2048, %s191_s10, [#allocation7], %s1258_s14, %s1258_s14, %s1259_s15  }
  0x17   : > { %s205_s13 = sshll.u32 %s1477_s3, 4  ;;  %s1468_s25 = smov 8   ;;  %s206_s13 = int_to_ptr.hbm [resolvable:$true] %s205_s13 }
  0x18   : > { %1007 = dma.hbm_to_vmem [thread:$0]  (!%p1002_p10), %s206_s13, 2048, %s208_s17, [#allocation7], %s1467_s24, %s1467_s24, %s1468_s25  }
  0x19   : > { %s34_s30 = sadd.s32 1, %s1251_s22  ;;  %s41_s6 = sadd.s32 1, %s1243_s20 }
  0x1a   : > { %p36_p12 = scmp.ge.s32.totalorder %s34_s30, 2  ;;  %p48_p13 = scmp.ne.s32.totalorder %s1243_s20, %s1239_s19 }
  0x1b   : > { %p49_p0 = scmp.eq.s32.totalorder %s1255_s23, 0  ;;  %p1018_p3 = scmp.lt.s32.totalorder %s1255_s23, 2 }
  0x1c   : > { %s1487_s30 = smov (%p36_p12, %s34_s30), 0  ;;  %p1377_p7 = por %p1333_p2, %p48_p13 }
  0x1d   : > { %p50_p5 = por %p49_p0, %p48_p13  ;;  %s38_s9 = ssub.s32 %s1251_s22, %s1487_s30 }
  0x1e   : > { %s224_s10 = sand.u32 1, %s1243_s20   ;;  %p39_p9 = scmp.eq.s32.totalorder %s38_s9, 0 }
  0x1f   : > { %s986_s11 = smul.u32 24, %s224_s10  ;;  %p1009_p10 = pnand %p1018_p3, %p50_p5 }
  0x20   : > { %s1385_s12 = scalar_select %p39_p9, %s1243_s20, %s41_s6  }
  0x21   : > { %s984_s13 = smul.u32 24, %s1251_s22  ;;  %s228_s14 = scalar_lea.vmem [#allocation3], %s986_s11 }
  0x22   : > { %s237_s15 = sshll.u32 %s228_s14, 4  ;;  %s225_s25 = scalar_lea.sflag [#allocation4], %s224_s10  ;;  %s238_s15 = int_to_ptr.vmem [resolvable:$true] %s237_s15 }
  0x23   : > { %s234_s24 = scalar_lea.hbm %s1461_s0, %s984_s13  ;;  %s1479_s1 = smov 8  }
  0x24   : > { %s235_s27 = sshll.u32 %s234_s24, 4  ;;  %s1480_s3 = smov 128   ;;  %s236_s27 = int_to_ptr.hbm [resolvable:$true] %s235_s27 }
  0x25   : > { %1011 = dma.hbm_to_vmem [thread:$0]  (!%p1009_p10), %s236_s27, 384, %s238_s15, %s225_s25, %s1480_s3, %s1480_s3, %s1479_s1  }
  0x26   : > { %249 = sbr.rel (%p1352_p8) target bundleno = 384 (0x180), region = 40  ;;  %s1397_s6 = sand.u32 (!%p1352_p8), 1, %s1239_s19  }
  0x27   : > { %s987_s9 = smul.u32 (!%p1352_p8), 24, %s1397_s6  ;;  %s252_s11 = scalar_lea.sflag (!%p1352_p8), [#allocation4], %s1397_s6 }
  0x29   : > { %s1401_s13 = scalar_lea.vmem (!%p1352_p8), [#allocation3], %s987_s9 }
  0x2b   : > { %1222 = dma.done.wait (%p1339_p4), %s252_s11, 384  }
  0x2c   : > { %1224 = vsyncadd (%p1339_p4), %s252_s11, 4294966912 }
  0x2d   : > { %1226 = dma.done.wait (%p1329_p1), [#allocation7], 4096  }
  0x2e   : > { %1228 = vsyncadd (%p1329_p1), [#allocation7], 4294963200  ;;  %v951_v0 = vld [vmem:[#allocation6 + $0x38] sm:$0xff]  ;;  %v950_v2 = vld [vmem:[#allocation6 + $0x30] sm:$0xff]  ;;  %s988_s8 = smul.u32 48, %s1397_s6  ;;  %s1189_s1 = scalar_lea.hbm %s1466_s5, 96 }
  0x2f   : > { %v959_v1 = vld [vmem:[#allocation6 + $0x78] sm:$0xff]  ;;  %452 = vmatpush.bf16.msra.mxu0 %v951_v0  ;;  %v958_v3 = vld [vmem:[#allocation6 + $0x70] sm:$0xff]  ;;  %v949_v4 = vld [vmem:[#allocation6 + $0x28] sm:$0xff]  ;;  %s985_s25 = smul.u32 48, %s1247_s21  ;;  %s661_s21 = scalar_lea.sflag [#allocation5], %s1397_s6 }
  0x30   : > { %470 = vmatpush.bf16.msra.mxu1 %v959_v1  ;;  %v957_v5 = vld [vmem:[#allocation6 + $0x68] sm:$0xff]  ;;  %v948_v6 = vld [vmem:[#allocation6 + $0x20] sm:$0xff]  ;;  %v947_v8 = vld [vmem:[#allocation6 + $0x18] sm:$0xff]  ;;  %s292_s24 = scalar_lea.vmem [#allocation9], %s988_s8 }
  0x31   : > { %v956_v7 = vld [vmem:[#allocation6 + $0x60] sm:$0xff]  ;;  %v955_v9 = vld [vmem:[#allocation6 + $0x58] sm:$0xff]  ;;  %v930_v10 = vld [vmem:[#allocation8 + $0x70] sm:$0xf]  ;;  %s675_s15 = scalar_lea.hbm %s1466_s5, %s985_s25  ;;  %s676_s16 = sshll.u32 %s292_s24, 4  ;;  %s677_s16 = int_to_ptr.vmem [resolvable:$true] %s676_s16 }
  0x32   : > { %v975_v11 = vld [vmem:[#allocation8 + $0x74] sm:$0xf0]  ;;  %v974_v12 = vld [vmem:[#allocation8 + $0x74] sm:$0xf]  ;;  %v932_v16 = vld [vmem:[#allocation8 + $0x78] sm:$0xf0] }
  0x33   : > { %453 = vmatpush.bf16.msra.mxu0 %v950_v2  ;;  %v946_v13 = vld [vmem:[#allocation6 + $0x10] sm:$0xff]  ;;  %v931_v15 = vor.u32 %v975_v11, %v930_v10  ;;  %v935_v17 = vor.u32 %v974_v12, %v932_v16  ;;  %v945_v18 = vld [vmem:[#allocation6 + $0x8] sm:$0xff]  ;;  %v944_v20 = vld [vmem:[#allocation6] sm:$0xff]  ;;  %s678_s17 = sshll.u32 %s675_s15, 4  ;;  %s679_s17 = int_to_ptr.hbm [resolvable:$true] %s678_s17 }
  0x34   : > { %471 = vmatpush.bf16.msra.mxu1 %v958_v3  ;;  %v954_v14 = vld [vmem:[#allocation6 + $0x50] sm:$0xff]  ;;  %v953_v19 = vld [vmem:[#allocation6 + $0x48] sm:$0xff]  ;;  %v952_v21 = vld [vmem:[#allocation6 + $0x40] sm:$0xff]  ;;  %s1183_s27 = sshra.s32 %s679_s17, 4  ;;  %s1184_s27 = int_to_ptr.hbm [resolvable:$true] %s1183_s27 }
  0x35   : > { %618 = vmatpush.bf16.msra.mxu2 %v931_v15  ;;  %636 = vmatpush.bf16.msra.mxu3 %v935_v17  ;;  %v798_v22 = vld [vmem:[%s1401_s13] sm:$0xf]  ;;  %v943_v23 = vld [vmem:[%s1401_s13 + $0x4] sm:$0xf0]  ;;  %v942_v24 = vld [vmem:[%s1401_s13 + $0x4] sm:$0xf]  ;;  %p1190_p8 = scmp.lt.s32.totalorder %s1184_s27, %s1466_s5 }
  0x36   : > { %v800_v25 = vld [vmem:[%s1401_s13 + $0x8] sm:$0xf0]  ;;  %v799_v26 = vor.u32 %v943_v23, %v798_v22  ;;  %v302_v28 = vld [vmem:[%s1401_s13 + $0x10] sm:$0xff]  ;;  %v973_v34 = vld [vmem:[#allocation8 + $0x64] sm:$0xf0]  ;;  %s1185_s9 = scalar_lea.hbm %s1184_s27, 48 }
  0x37   : > { %454 = vmatpush.bf16.msra.mxu0 %v949_v4  ;;  %v803_v27 = vor.u32 %v942_v24, %v800_v25  ;;  %v346_v29 = vunpack.c.l.b16 %v302_v28  ;;  %v347_v30 = vunpack.c.h.b16 %v302_v28  ;;  %v922_v33 = vld [vmem:[#allocation8 + $0x60] sm:$0xf]  ;;  %v972_v35 = vld [vmem:[#allocation8 + $0x64] sm:$0xf]  ;;  %v924_v37 = vld [vmem:[#allocation8 + $0x68] sm:$0xf0]  ;;  %p1186_p1 = scmp.ne.s32.totalorder %s1184_s27, %s1185_s9  ;;  %p1191_p12 = scmp.lt.s32.totalorder %s1189_s1, %s1185_s9 }
  0x38   : > { %472 = vmatpush.bf16.msra.mxu1 %v957_v5  ;;  %v923_v36 = vor.u32 %v973_v34, %v922_v33  ;;  %v927_v38 = vor.u32 %v972_v35, %v924_v37  ;;  %v914_v39 = vld [vmem:[#allocation8 + $0x50] sm:$0xf]  ;;  %v971_v40 = vld [vmem:[#allocation8 + $0x54] sm:$0xf0]  ;;  %v970_v41 = vld [vmem:[#allocation8 + $0x54] sm:$0xf] }
  0x39   : > { %v350_v31 = vpack.c.b16 %v346_v29, %v346_v29  ;;  %v351_v32 = vpack.c.b16 %v347_v30, %v347_v30  ;;  %v915_v42 = vor.u32 %v971_v40, %v914_v39  ;;  %v916_v43 = vld [vmem:[#allocation8 + $0x58] sm:$0xf0]  ;;  %v906_v45 = vld [vmem:[#allocation8 + $0x40] sm:$0xf]  ;;  %v969_v46 = vld [vmem:[#allocation8 + $0x44] sm:$0xf0]  ;;  %p1187_p2 = pnand %p1186_p1, %p1377_p7  ;;  %p1192_p13 = por %p1191_p12, %p1190_p8 }
  0x3a   : > { %619 = vmatpush.bf16.msra.mxu2 %v923_v36  ;;  %637 = vmatpush.bf16.msra.mxu3 %v927_v38  ;;  %v919_v44 = vor.u32 %v970_v41, %v916_v43  ;;  %v968_v47 = vld [vmem:[#allocation8 + $0x44] sm:$0xf]  ;;  %v907_v48 = vor.u32 %v969_v46, %v906_v45  ;;  %v908_v49 = vld [vmem:[#allocation8 + $0x48] sm:$0xf0]  ;;  %v898_v51 = vld [vmem:[#allocation8 + $0x30] sm:$0xf] }
  0x3b   : > { %455 = vmatpush.bf16.msra.mxu0 %v948_v6  ;;  %v911_v50 = vor.u32 %v968_v47, %v908_v49  ;;  %v967_v52 = vld [vmem:[#allocation8 + $0x34] sm:$0xf0]  ;;  %v966_v53 = vld [vmem:[#allocation8 + $0x34] sm:$0xf]  ;;  %v900_v55 = vld [vmem:[#allocation8 + $0x38] sm:$0xf0]  ;;  %p1188_p4 = pneg %p1187_p2 }
  0x3c   : > { %473 = vmatpush.bf16.msra.mxu1 %v956_v7  ;;  %v899_v54 = vor.u32 %v967_v52, %v898_v51  ;;  %v903_v56 = vor.u32 %v966_v53, %v900_v55  ;;  %v890_v57 = vld [vmem:[#allocation8 + $0x20] sm:$0xf]  ;;  %v965_v58 = vld [vmem:[#allocation8 + $0x24] sm:$0xf0]  ;;  %v964_v59 = vld [vmem:[#allocation8 + $0x24] sm:$0xf] }
  0x3d   : > { %v891_v60 = vor.u32 %v965_v58, %v890_v57  ;;  %v892_v61 = vld [vmem:[#allocation8 + $0x28] sm:$0xf0]  ;;  %v882_v63 = vld [vmem:[#allocation8 + $0x10] sm:$0xf]  ;;  %v963_v0 = vld [vmem:[#allocation8 + $0x14] sm:$0xf0]  ;;  %p1193_p0 = pnand %p1192_p13, %p1188_p4 }
  0x3e   : > { %620 = vmatpush.bf16.msra.mxu2 %v915_v42  ;;  %638 = vmatpush.bf16.msra.mxu3 %v919_v44  ;;  %v895_v62 = vor.u32 %v964_v59, %v892_v61  ;;  %v962_v1 = vld [vmem:[#allocation8 + $0x14] sm:$0xf]  ;;  %v883_v2 = vor.u32 %v963_v0, %v882_v63  ;;  %v884_v3 = vld [vmem:[#allocation8 + $0x18] sm:$0xf0]  ;;  %v874_v5 = vld [vmem:[#allocation8] sm:$0xf] }
  0x3f   : > { %456 = vmatpush.bf16.msra.mxu0 %v947_v8  ;;  %v887_v4 = vor.u32 %v962_v1, %v884_v3  ;;  %v961_v6 = vld [vmem:[#allocation8 + $0x4] sm:$0xf0]  ;;  %v960_v7 = vld [vmem:[#allocation8 + $0x4] sm:$0xf] }
  0x40   : > { %474 = vmatpush.bf16.msra.mxu1 %v955_v9  ;;  %v875_v8 = vor.u32 %v961_v6, %v874_v5  ;;  %v876_v9 = vld [vmem:[#allocation8 + $0x8] sm:$0xf0]  ;;  %v519_v35 = vld [vmem:[%s1465_s4] sm:$0x3] }
  0x41   : > { %v879_v10 = vor.u32 %v960_v7, %v876_v9  ;;  %v524_v36 = vperm.slane %v519_v35, 0  ;;  %v525_v37 = vperm.slane %v519_v35, 1 }
  0x42   : > { %621 = vmatpush.bf16.msra.mxu2 %v907_v48  ;;  %639 = vmatpush.bf16.msra.mxu3 %v911_v50 }
  0x43   : > { %457 = vmatpush.bf16.msra.mxu0 %v946_v13  ;;  %v1078_v13 = vld [vmem:[%s1463_s2] ss:$0 sm:$0xff] }
  0x44   : > { %475 = vmatpush.bf16.msra.mxu1 %v954_v14 }
  0x46   : > { %622 = vmatpush.bf16.msra.mxu2 %v899_v54  ;;  %640 = vmatpush.bf16.msra.mxu3 %v903_v56 }
  0x47   : > { %458 = vmatpush.bf16.msra.mxu0 %v945_v18 }
  0x48   : > { %476 = vmatpush.bf16.msra.mxu1 %v953_v19 }
  0x4a   : > { %623 = vmatpush.bf16.msra.mxu2 %v891_v60  ;;  %641 = vmatpush.bf16.msra.mxu3 %v895_v62 }
  0x4b   : > { %459 = vmatpush.bf16.msra.mxu0 %v944_v20 }
  0x4c   : > { %477 = vmatpush.bf16.msra.mxu1 %v952_v21 }
  0x4e   : > { %460 = vmatmul.bf16.vlgmr.msra.gmra.mxu0 %v799_v26  ;;  %624 = vmatpush.bf16.msra.mxu2 %v883_v2 }
  0x4f   : > { %478 = vmatmul.bf16.vlgmr.msra.gmra.mxu1 %v803_v27  ;;  %642 = vmatpush.bf16.msra.mxu3 %v887_v4 }
  0x52   : > { %625 = vmatpush.bf16.msra.mxu2 %v875_v8 }
  0x53   : > { %643 = vmatpush.bf16.msra.mxu3 %v879_v10 }
  0x5e   : > { %465 = vmatmul.bf16.gmra.mxu0 %v350_v31 }
  0x5f   : > { %483 = vmatmul.bf16.gmra.mxu1 %v351_v32 }
  0xcb   : > { %v461_v11 = vpop.f32.mrf.mxu0 }
  0xcc   : > { %v479_v12 = vpop.f32.mrf.mxu1  ;;  %v462_v14 = vadd.f32 %v1078_v13, %v461_v11 }
  0xce   : > { %v480_v17 = vadd.f32 %v479_v12, %v462_v14 }
  0xd0   : > { %v488_v20 = vmax.f32 %v480_v17, 0.0 }
  0xd3   : > { %v463_v15 = vpop.f32.mrf.mxu0 }
  0xd4   : > { %v481_v16 = vpop.f32.mrf.mxu1  ;;  %v464_v18 = vadd.f32 %v1078_v13, %v463_v15 }
  0xd6   : > { %v482_v19 = vadd.f32 %v481_v16, %v464_v18 }
  0xd8   : > { %v489_v21 = vmax.f32 %v482_v19, 0.0 }
  0xda   : > { %v982_v22 = vpack.c.bf16 %v489_v21, %v488_v20 }
  0xdb   : > { %v466_v23 = vpop.f32.mrf.mxu0 }
  0xdc   : > { %v484_v24 = vpop.f32.mrf.mxu1  ;;  %983 = vst [vmem:[#allocation2] sm:$0xff] %v982_v22   ;;  %v467_v25 = vadd.f32 %v1078_v13, %v466_v23 }
  0xde   : > { %v485_v26 = vadd.f32 %v484_v24, %v467_v25 }
  0xe0   : > { %v490_v27 = vmax.f32 %v485_v26, 0.0 }
  0xe2   : > { %v493_v28 = vpack.c.bf16 %v490_v27, %v490_v27 }
  0xe3   : > { %v468_v29 = vpop.f32.mrf.mxu0  ;;  %v976_v31 = vld [vmem:[#allocation2] sm:$0xff] }
  0xe4   : > { %v486_v30 = vpop.f32.mrf.mxu1  ;;  %496 = vst [vmem:[#allocation2 + $0x8] sm:$0xf] %v493_v28  ;;  %626 = vmatmul.bf16.vlgmr.msra.gmra.mxu2 %v976_v31  ;;  %644 = vmatmul.bf16.vlgmr.msra.gmra.mxu3 %v976_v31 }
  0xeb   : > { %v522_v32 = vld [vmem:[#allocation2 + $0x8] sm:$0xf] }
  0xec   : > { %v533_v33 = vunpack.c.l.b16 %v522_v32 }
  0xee   : > { %v535_v34 = vpack.c.b16 %v533_v33, %v533_v33 }
  0xf4   : > { %631 = vmatmul.bf16.gmra.mxu2 %v535_v34  ;;  %649 = vmatmul.bf16.gmra.mxu3 %v535_v34 }
 0x167   : > { %v627_v38 = vpop.f32.mrf.mxu2  ;;  %v645_v39 = vpop.f32.mrf.mxu3 }
 0x168   : > { %v628_v40 = vadd.f32 %v627_v38, %v524_v36  ;;  %v646_v41 = vadd.f32 %v645_v39, %v525_v37 }
 0x16a   : > { %654 = vst [vmem:[%s292_s24] sm:$0xff] %v628_v40 }
 0x16b   : > { %655 = vst [vmem:[%s292_s24 + $0x8] sm:$0xff] %v646_v41 }
 0x16f   : > { %v629_v42 = vpop.f32.mrf.mxu2  ;;  %v647_v43 = vpop.f32.mrf.mxu3 }
 0x170   : > { %v630_v44 = vadd.f32 %v629_v42, %v524_v36  ;;  %v648_v45 = vadd.f32 %v647_v43, %v525_v37 }
 0x172   : > { %656 = vst [vmem:[%s292_s24 + $0x10] sm:$0xff] %v630_v44 }
 0x173   : > { %657 = vst [vmem:[%s292_s24 + $0x18] sm:$0xff] %v648_v45 }
 0x177   : > { %v632_v46 = vpop.f32.mrf.mxu2  ;;  %v650_v47 = vpop.f32.mrf.mxu3 }
 0x178   : > { %v633_v48 = vadd.f32 %v632_v46, %v524_v36  ;;  %v651_v49 = vadd.f32 %v650_v47, %v525_v37 }
 0x17a   : > { %658 = vst [vmem:[%s292_s24 + $0x20] sm:$0xff] %v633_v48 }
 0x17b   : > { %659 = vst [vmem:[%s292_s24 + $0x28] sm:$0xff] %v651_v49 }
 0x17c   : > { %1196 = shalt.err (!%p1193_p0)
}
 0x17d   : > { %s1263_s6 = smov 256   ;;  %s1264_s28 = smov 16  }
 0x17e   : > { %999 = dma.vmem_to_hbm [thread:$0]  (%p1377_p7), %s677_s16, 768, %s679_s17, %s661_s21, %s1263_s6, %s1263_s6, %s1264_s28  }
 0x17f   : > { %v634_v50 = vpop.f32.mrf.mxu2  ;;  %v652_v51 = vpop.f32.mrf.mxu3 }
 0x180 PF: > { %s693_s8 = sand.u32 1, %s1235_s18   ;;  %p1013_p3 = pnand %p790_p11, %p1344_p6 }
 0x181   : > { %s694_s24 = scalar_lea.sflag [#allocation5], %s693_s8 }
 0x182   : > { %p1014_p5 = pneg %p1013_p3 }
 0x184   : > { %1230 = dma.done.wait (%p1014_p5), %s694_s24, 768  }
 0x185   : > { %1232 = vsyncadd (%p1014_p5), %s694_s24, 4294966528  ;;  %s22_s23 = sadd.s32 1, %s1255_s23   ;;  %s1481_s18 = smov %s1239_s19 }
 0x186   : > { %p19_p9 = scmp.ge.s32.totalorder %s22_s23, 4   ;;  %s1482_s19 = smov %s1243_s20 }
 0x187   : > { %s1483_s20 = smov %s1385_s12  ;;  %s1484_s21 = smov %s1251_s22 }
 0x188   : > { %s1485_s22 = smov %s1487_s30  ;;  %21 = sbr.rel (!%p19_p9) target bundleno = 10 (0xa), region = 99 }
 0x18d   :  { %700 = vsyncpa [#allocation4], 1 }
 0x18e   :  { %702 = vsyncpa [#allocation4 + $0x1], 1 }
 0x18f   :  { %703 = vsyncpa [#allocation7], 1 }
 0x190   :  { %704 = vsyncpa [#allocation5], 1 }
 0x191   :  { %706 = vsyncpa [#allocation5 + $0x1], 1 }

</bundles_post_ra>
